<compile_context>
chip_gen: v7x
topology: tpu7x:2x2x1
jax: 0.10.0
libtpu: 0.0.40
codegen_flags: <defaults>
</compile_context>

<pallas_src>
import math

import jax
import jax.numpy as jnp
from jax.experimental import pallas as pl
from jax.experimental.pallas import tpu as pltpu


def _round_up(n, m):
    return ((n + m - 1) // m) * m


def _hyperhead_split_kernel(x_ref, w_ref, b_ref, wout_ref, bout_ref):
    """One fused MXU matmul; split the f32 accumulator into the two outputs."""
    flat_out = wout_ref.shape[-1]
    acc = jnp.dot(x_ref[...].astype(w_ref.dtype), w_ref[...],
                  preferred_element_type=jnp.float32) + b_ref[...]
    wout_ref[...] = acc[:, :flat_out].astype(wout_ref.dtype)
    bout_ref[...] = acc[:, flat_out:].astype(bout_ref.dtype)


def _hyperhead_fused_kernel(x_ref, w_ref, b_ref, out_ref):
    """Fallback: single fused output (used only when flat_out % 128 != 0)."""
    out_ref[...] = (jnp.dot(x_ref[...].astype(w_ref.dtype), w_ref[...],
                            preferred_element_type=jnp.float32)
                    + b_ref[...]).astype(out_ref.dtype)


def _cost_estimate(batch, f_in, flat_out, hypo_out, x_dtype, w_dtype):
    fused_out = flat_out + hypo_out
    xb = jnp.dtype(x_dtype).itemsize
    wb = jnp.dtype(w_dtype).itemsize
    return pl.CostEstimate(
        flops=2 * batch * f_in * fused_out,
        transcendentals=0,
        bytes_accessed=(batch * f_in * xb          # activations
                        + f_in * fused_out * wb    # fused weight
                        + fused_out * 4            # fused bias (f32)
                        + batch * fused_out * xb)  # outputs
    )


def _vmem_limit_bytes(tm, f_in, flat_out, hypo_out, x_dtype, w_dtype):
    fused_out = flat_out + hypo_out
    xb = jnp.dtype(x_dtype).itemsize
    wb = jnp.dtype(w_dtype).itemsize
    # Every BlockSpec operand is double-buffered by default.
    need = 2 * (tm * f_in * xb             # x tile
                + f_in * fused_out * wb    # resident fused weight
                + fused_out * 4            # fused bias (f32)
                + tm * flat_out * xb       # weight-flat output tile
                + tm * hypo_out * xb)      # bias output tile
    return int(min(max(2 * need, 8 << 20), 100 << 20))


def hyperhead_forward(x, fused_weight_t, fused_bias, hypo_in, hypo_out, *,
                      batch_tile=512, min_pallas_batch=64):
    """x: (B, f_in); fused_weight_t: (f_in, flat_out + hypo_out);
       fused_bias: (1, flat_out + hypo_out), f32; flat_out = hypo_in*hypo_out.
       Returns (weight (B, hypo_out, hypo_in), bias (B, hypo_out))."""
    batch, f_in = x.shape
    flat_out = hypo_in * hypo_out
    fused_out = flat_out + hypo_out
    assert fused_weight_t.shape == (f_in, fused_out)
    assert fused_bias.shape == (1, fused_out)
    out_dtype = x.dtype

    # Tiny-call bypass: dispatch + a single grid step dominates ~KFLOPs of work.
    if batch < max(min_pallas_batch, 8):
        acc = jnp.dot(x.astype(fused_weight_t.dtype), fused_weight_t,
                      preferred_element_type=jnp.float32) + fused_bias
        acc = acc.astype(out_dtype)
        weight = acc[:, :flat_out].reshape(batch, hypo_out, hypo_in)
        return weight, acc[:, flat_out:]

    # Batch-tiled Pallas path: weights/bias stay VMEM-resident (block index
    # fixed), batch axis is "parallel" so multi-TC chips split the grid.
    # Target >=4 grid steps when the batch allows it, else 512-row tiles.
    tm = min(batch_tile, max(8, _round_up(pl.cdiv(batch, 4), 8)))
    grid = (pl.cdiv(batch, tm),)   # ragged last block: Pallas masks its stores

    in_specs = [
        pl.BlockSpec((tm, f_in), lambda i: (i, 0)),
        pl.BlockSpec((f_in, fused_out), lambda i: (0, 0)),   # resident
        pl.BlockSpec((1, fused_out), lambda i: (0, 0)),      # resident
    ]

    split = (flat_out % 128 == 0)
    if split:
        kernel = _hyperhead_split_kernel
        out_shape = (jax.ShapeDtypeStruct((batch, flat_out), out_dtype),
                     jax.ShapeDtypeStruct((batch, hypo_out), out_dtype))
        out_specs = (pl.BlockSpec((tm, flat_out), lambda i: (i, 0)),
                     pl.BlockSpec((tm, hypo_out), lambda i: (i, 0)))
    else:
        kernel = _hyperhead_fused_kernel
        out_shape = jax.ShapeDtypeStruct((batch, fused_out), out_dtype)
        out_specs = pl.BlockSpec((tm, fused_out), lambda i: (i, 0))

    outs = pl.pallas_call(
        kernel,
        out_shape=out_shape,
        grid=grid,
        in_specs=in_specs,
        out_specs=out_specs,
        compiler_params=pltpu.CompilerParams(
            dimension_semantics=("parallel",),
            vmem_limit_bytes=_vmem_limit_bytes(
                tm, f_in, flat_out, hypo_out, x.dtype, fused_weight_t.dtype)),
        cost_estimate=_cost_estimate(
            batch, f_in, flat_out, hypo_out, x.dtype, fused_weight_t.dtype),
    )(x, fused_weight_t, fused_bias)

    if split:
        weight_flat, bias = outs
    else:
        weight_flat = outs[:, :flat_out]
        bias = outs[:, flat_out:]
    weight = weight_flat.reshape(batch, hypo_out, hypo_in)  # row-major, free
    return weight, bias


def init_hyperhead_params(key, f_in, hypo_in, hypo_out, dtype=jnp.float32):
    """Mirror HyperHead.__init__: kaiming_normal(fan_in, relu)/100 weights;
    weight_linear.bias ~ U(-1/hypo_in, 1/hypo_in); bias_linear.bias ~ U(-1/f_in, 1/f_in).
    Weights are sampled in f32, concatenated along the output dim, transposed to
    (f_in, out) for a lane-dense matmul, then cast to `dtype` (f32 or bf16).
    The fused bias stays f32 (the kernel accumulates and adds bias in f32)."""
    k1, k2, k3, k4 = jax.random.split(key, 4)
    flat_out = hypo_in * hypo_out
    std = math.sqrt(2.0 / f_in)

    w_weight = jax.random.normal(k1, (flat_out, f_in), jnp.float32) * std / 100.0
    w_bias = jax.random.uniform(k2, (flat_out,), jnp.float32,
                                minval=-1.0 / hypo_in, maxval=1.0 / hypo_in)
    b_weight = jax.random.normal(k3, (hypo_out, f_in), jnp.float32) * std / 100.0
    b_bias = jax.random.uniform(k4, (hypo_out,), jnp.float32,
                                minval=-1.0 / f_in, maxval=1.0 / f_in)

    fused_weight_t = jnp.concatenate([w_weight.T, b_weight.T], axis=1).astype(dtype)
    fused_bias = jnp.concatenate([w_bias, b_bias]).reshape(1, flat_out + hypo_out)
    return {"fused_weight_t": fused_weight_t, "fused_bias": fused_bias}


if __name__ == "__main__":
    f_in, hypo_in, hypo_out = 32, 16, 8
    flat_out = hypo_in * hypo_out        # 128 -> two-output split kernel

    key = jax.random.PRNGKey(0)
    kx, kp, kx2 = jax.random.split(key, 3)

    params = init_hyperhead_params(kp, f_in, hypo_in, hypo_out, dtype=jnp.float32)
    wT, fb = params["fused_weight_t"], params["fused_bias"]

    # 1) Module-native tiny batch: plain-JAX bypass path.
    x_small = jax.random.normal(kx, (2, f_in), jnp.float32)
    w_s, b_s = hyperhead_forward(x_small, wT, fb, hypo_in, hypo_out)
    jax.block_until_ready((w_s, b_s))
    ref_s = x_small @ wT + fb
    assert w_s.shape == (2, hypo_out, hypo_in)
    assert b_s.shape == (2, hypo_out)
    assert jnp.allclose(w_s, ref_s[:, :flat_out].reshape(2, hypo_out, hypo_in),
                        atol=1e-5, rtol=1e-5)
    assert jnp.allclose(b_s, ref_s[:, flat_out:], atol=1e-5, rtol=1e-5)

    # 2) Pallas batch-tiled path (grid of 4, ragged last block -> masked stores).
    batch = 300
    x_big = jax.random.normal(kx2, (batch, f_in), jnp.float32)
    w_b, b_b = hyperhead_forward(x_big, wT, fb, hypo_in, hypo_out)
    jax.block_until_ready((w_b, b_b))
    ref_b = x_big @ wT + fb
    assert w_b.shape == (batch, hypo_out, hypo_in)
    assert b_b.shape == (batch, hypo_out)
    assert jnp.allclose(w_b, ref_b[:, :flat_out].reshape(batch, hypo_out, hypo_in),
                        atol=1e-5, rtol=1e-5)
    assert jnp.allclose(b_b, ref_b[:, flat_out:], atol=1e-5, rtol=1e-5)

    # 3) bf16 operand storage (HBM-bound recommendation for v6e/v7x):
    #    weights in bf16, x cast to bf16 in-kernel, f32 accumulation + f32 bias.
    params16 = init_hyperhead_params(kp, f_in, hypo_in, hypo_out, dtype=jnp.bfloat16)
    wT16, fb16 = params16["fused_weight_t"], params16["fused_bias"]
    w_h, b_h = hyperhead_forward(x_big, wT16, fb16, hypo_in, hypo_out)
    jax.block_until_ready((w_h, b_h))
    ref_h = (x_big.astype(jnp.bfloat16).astype(jnp.float32)
             @ wT16.astype(jnp.float32)) + fb16
    assert jnp.allclose(w_h, ref_h[:, :flat_out].reshape(batch, hypo_out, hypo_in),
                        atol=1e-3, rtol=1e-2)
    assert jnp.allclose(b_h, ref_h[:, flat_out:], atol=1e-3, rtol=1e-2)

    print("KERNEL_OK")
</pallas_src>

<mosaic_0001>
module attributes {stable_mosaic.version = 11 : i64} {
  func.func @_hyperhead_split_kernel(%arg0: i32, %arg1: memref<80x32xf32, #tpu.memory_space<vmem>>, %arg2: memref<32x136xf32, #tpu.memory_space<vmem>>, %arg3: memref<1x136xf32, #tpu.memory_space<vmem>>, %arg4: memref<80x128xf32, #tpu.memory_space<vmem>>, %arg5: memref<80x8xf32, #tpu.memory_space<vmem>>) attributes {dimension_semantics = [#tpu.dimension_semantics<parallel>], iteration_bounds = array<i64: 4>, scalar_prefetch = 0 : i64, scratch_operands = 0 : i64, tpu.core_type = #tpu.core_type<tc>, window_params = [{transform_indices = @transform_0, window_bounds = array<i64: 80, 32>}, {pipeline_mode = #tpu.pipeline_mode<synchronous>, transform_indices = @transform_1, window_bounds = array<i64: 32, 136>}, {pipeline_mode = #tpu.pipeline_mode<synchronous>, transform_indices = @transform_2, window_bounds = array<i64: 1, 136>}, {transform_indices = @transform_3, window_bounds = array<i64: 80, 128>}, {transform_indices = @transform_4, window_bounds = array<i64: 80, 8>}]} {
    %c0 = arith.constant 0 : index
    %c0_0 = arith.constant 0 : index
    %0 = vector.load %arg1[%c0, %c0_0] : memref<80x32xf32, #tpu.memory_space<vmem>>, vector<80x32xf32>
    %c0_1 = arith.constant 0 : index
    %c0_2 = arith.constant 0 : index
    %1 = vector.load %arg2[%c0_1, %c0_2] : memref<32x136xf32, #tpu.memory_space<vmem>>, vector<32x136xf32>
    %cst = arith.constant dense<0.000000e+00> : vector<80x136xf32>
    %2 = tpu.matmul %0, %1, %cst {dimension_numbers = #tpu.dot_dimension_numbers<[1], [0], [0], [1], [0, 0, 1, 1], [], []>} : vector<80x32xf32>, vector<32x136xf32>, vector<80x136xf32> -> vector<80x136xf32>
    %c0_3 = arith.constant 0 : index
    %c0_4 = arith.constant 0 : index
    %3 = vector.load %arg3[%c0_3, %c0_4] : memref<1x136xf32, #tpu.memory_space<vmem>>, vector<1x136xf32>
    %4 = vector.broadcast %3 : vector<1x136xf32> to vector<80x136xf32>
    %5 = arith.addf %2, %4 : vector<80x136xf32>
    %6 = vector.extract_strided_slice %5 {offsets = [0, 0], sizes = [80, 128], strides = [1, 1]} : vector<80x136xf32> to vector<80x128xf32>
    %c0_5 = arith.constant 0 : index
    %c0_6 = arith.constant 0 : index
    %7 = vector.load %arg4[%c0_5, %c0_6] : memref<80x128xf32, #tpu.memory_space<vmem>>, vector<80x128xf32>
    tpu.vector_store %arg4[%c0_5, %c0_6], %6 {strides = array<i32>} : memref<80x128xf32, #tpu.memory_space<vmem>>, vector<80x128xf32>,
    %8 = vector.extract_strided_slice %5 {offsets = [0, 128], sizes = [80, 8], strides = [1, 1]} : vector<80x136xf32> to vector<80x8xf32>
    %c0_7 = arith.constant 0 : index
    %c0_8 = arith.constant 0 : index
    %9 = vector.load %arg5[%c0_7, %c0_8] : memref<80x8xf32, #tpu.memory_space<vmem>>, vector<80x8xf32>
    tpu.vector_store %arg5[%c0_7, %c0_8], %8 {strides = array<i32>} : memref<80x8xf32, #tpu.memory_space<vmem>>, vector<80x8xf32>,
    return
  }
  func.func @transform_0(%arg0: i32) -> (i32, i32) {
    %c0_i32 = arith.constant 0 : i32
    %c0_i32_0 = arith.constant 0 : i32
    return %arg0, %c0_i32 : i32, i32
  }
  func.func @transform_1(%arg0: i32) -> (i32, i32) {
    %c0_i32 = arith.constant 0 : i32
    %c0_i32_0 = arith.constant 0 : i32
    %c0_i32_1 = arith.constant 0 : i32
    return %c0_i32, %c0_i32_0 : i32, i32
  }
  func.func @transform_2(%arg0: i32) -> (i32, i32) {
    %c0_i32 = arith.constant 0 : i32
    %c0_i32_0 = arith.constant 0 : i32
    %c0_i32_1 = arith.constant 0 : i32
    return %c0_i32, %c0_i32_0 : i32, i32
  }
  func.func @transform_3(%arg0: i32) -> (i32, i32) {
    %c0_i32 = arith.constant 0 : i32
    %c0_i32_0 = arith.constant 0 : i32
    return %arg0, %c0_i32 : i32, i32
  }
  func.func @transform_4(%arg0: i32) -> (i32, i32) {
    %c0_i32 = arith.constant 0 : i32
    %c0_i32_0 = arith.constant 0 : i32
    return %arg0, %c0_i32 : i32, i32
  }
}

</mosaic_0001>

<bundles_post_ra>
// kernel: tpu_custom_call.1
= control target key start
LH: loop header
LB: loop body
LE: loop exit
PB: predicated region body
PF: predicated region fallthrough
CT: control target
= control target key end

     0   :  { %10 = vsyncpa [#allocation3], 0  ;;  %s1310_s0 = inlined_call_operand.vmem [shape: f32[300,32], index: 0, kind: input, shape index: {}]   ;;  %s1311_s1 = inlined_call_operand.vmem [shape: f32[32,136], index: 1, kind: input, shape index: {}]   ;;  %s1312_s2 = inlined_call_operand.vmem [shape: f32[1,136], index: 2, kind: input, shape index: {}]   ;;  %s1313_s3 = inlined_call_operand.hbm [shape: f32[300,128], index: 3, kind: output, shape index: {0}]   ;;  %s1314_s4 = inlined_call_operand.vmem [shape: f32[300,8], index: 4, kind: output, shape index: {1}]  }
   0x1   :  { %12 = vsyncpa [#allocation3 + $0x1], 0  ;;  %s1068_s15 = smov 0   ;;  %s1070_s16 = smov 0  }
   0x2   :  { %s1072_s17 = smov 0   ;;  %s1074_s18 = smov 0  }
   0x3 LB: > { %s1089_s19 = sadd.s32 4294967295, %s1005_s18   ;;  %s754_s20 = sadd.s32 4294967294, %s1005_s18   ;;  %s1005_s18 = sphi %s1074_s18, %s1323_s18   ;;  %s1001_s17 = sphi %s1072_s17, %s1322_s17   ;;  %s997_s16 = sphi %s1070_s16, %s1321_s16   ;;  %s993_s15 = sphi %s1068_s15, %s1320_s15  }
   0x4   : > { %s1093_s21 = sadd.s32 1, %s1005_s18   ;;  %s93_s22 = sadd.s32 1, %s1001_s17 }
   0x5   : > { %s90_s23 = ssub.s32 %s1005_s18, %s1093_s21  ;;  %p103_p0 = scmp.ne.s32.totalorder %s1001_s17, %s997_s16 }
   0x6   : > { %p91_p1 = scmp.eq.s32.totalorder %s90_s23, 0  ;;  %p104_p2 = scmp.eq.s32.totalorder %s1089_s19, 3 }
   0x7   : > { %p109_p3 = scmp.ne.s32.totalorder %s997_s16, %s993_s15  ;;  %p110_p4 = scmp.eq.s32.totalorder %s754_s20, 3 }
   0x8   : > { %s1104_s24 = scalar_select %p91_p1, %s1001_s17, %s93_s22  }
   0x9   : > { %p1106_p5 = por %p104_p2, %p103_p0  ;;  %p1110_p6 = por %p110_p4, %p109_p3 }
   0xa   : > { %p757_p7 = scmp.ge.s32.totalorder %s1005_s18, 1  ;;  %p177_p8 = scmp.lt.s32.totalorder %s1005_s18, 5 }
   0xc   : > { %p178_p9 = pnand %p757_p7, %p177_p8 }
   0xd   : > { %v246_v0 = vld [vmem:[%s1311_s1 + $0x8] sm:$0xff] (!%p178_p9)  ;;  %v248_v1 = vld [vmem:[%s1311_s1 + $0x18] sm:$0xff] (!%p178_p9)  ;;  %v245_v2 = vld [vmem:[%s1311_s1] sm:$0xff] (!%p178_p9)  ;;  %s1126_s7 = smul.u32 (!%p178_p9), 10, %s1089_s19  ;;  %v1039_v7 = vmov (!%p178_p9), 0.0   ;;  %vm265_vm0 = vcmask (!%p178_p9), 261120   ;;  %v255_v23 = vlaneseq (!%p178_p9) }
   0xe   : > { %181 = sbr.rel (%p178_p9) target bundleno = 354 (0x162), region = 32  ;;  %v788_v3 = vpack.c.bf16 (!%p178_p9), %v248_v1, %v246_v0  ;;  %v247_v4 = vld [vmem:[%s1311_s1 + $0x10] sm:$0xff] (!%p178_p9)  ;;  %v250_v5 = vld [vmem:[%s1311_s1 + $0x28] sm:$0xff] (!%p178_p9)  ;;  %v252_v6 = vld [vmem:[%s1311_s1 + $0x38] sm:$0xff] (!%p178_p9)  ;;  %360 = vmatprep.mubr.f32.mxu0 (!%p178_p9), %v1039_v7  ;;  %390 = vmatprep.mubr.f32.mxu1 (!%p178_p9), %v1039_v7  ;;  %s202_s6 = sand.u32 (!%p178_p9), 1, %s997_s16   ;;  %vm431_vm1 = vcmask (!%p178_p9), 64512  }
   0xf   : > { %v790_v8 = vpack.c.bf16 (!%p178_p9), %v247_v4, %v245_v2  ;;  %v792_v9 = vpack.c.bf16 (!%p178_p9), %v252_v6, %v250_v5  ;;  %v249_v10 = vld [vmem:[%s1311_s1 + $0x20] sm:$0xff] (!%p178_p9)  ;;  %v251_v11 = vld [vmem:[%s1311_s1 + $0x30] sm:$0xff] (!%p178_p9)  ;;  %p216_p10 = scmp.lt.s32.totalorder (!%p178_p9), %s1126_s7, 37  ;;  %v256_v24 = vshrl.u32 (!%p178_p9), %v255_v23, 7  ;;  %s800_s10 = smul.u32 (!%p178_p9), 80, %s202_s6 }
  0x10   : > { %789 = vmatprep.subr.bf16.mxu0 (!%p178_p9), %v788_v3  ;;  %796 = vmatprep.subr.bf16.mxu1 (!%p178_p9), %v788_v3  ;;  %v794_v12 = vpack.c.bf16 (!%p178_p9), %v251_v11, %v249_v10  ;;  %v253_v26 = vld [vmem:[%s1312_s2] sm:$0x3] (!%p178_p9)  ;;  %s1200_s13 = scalar_lea.sflag (!%p178_p9), [#allocation3], %s202_s6 }
  0x11   : > { %791 = vmatpush1.bf16.msra.mxu0 (!%p178_p9), %v790_v8  ;;  %798 = vmatpush1.bf16.msra.mxu1 (!%p178_p9), %v790_v8  ;;  %v257_v25 = vsub.s32 (!%p178_p9), 0, %v256_v24  ;;  %v261_v27 = vsub.s32 (!%p178_p9), 1, %v256_v24  ;;  %s1164_s11 = scalar_lea.vmem (!%p178_p9), [#allocation2], %s800_s10  ;;  %s1168_s12 = scalar_lea.vmem (!%p178_p9), [#allocation4], %s800_s10  }
  0x12   : > { %793 = vmatprep.subr.bf16.mxu0 (!%p178_p9), %v792_v9  ;;  %797 = vmatprep.subr.bf16.mxu1 (!%p178_p9), %v792_v9 }
  0x13   : > { %v258_v28 = vrot.slane (!%p178_p9), %v253_v26, %v257_v25  ;;  %v262_v29 = vrot.slane (!%p178_p9), %v253_v26, %v261_v27 }
  0x15   : > { %s217_s27 = scalar_select %p216_p10, %s1126_s7, 37  ;;  %795 = vmatpush1.bf16.msra.mxu0 %v794_v12  ;;  %799 = vmatpush1.bf16.msra.mxu1 %v794_v12 }
  0x16   : > { %s455_s14 = ssub.s32 (%p1106_p5), 38, %s1126_s7 }
  0x17   : > { %s758_s28 = sshll.u32 %s217_s27, 3  ;;  %p456_p11 = scmp.lt.s32.totalorder (%p1106_p5), %s455_s14, 10 }
  0x18   : > { %s219_s5 = scalar_lea.vmem %s1310_s0, %s758_s28 }
  0x19   : > { %v235_v13 = vld [vmem:[%s219_s5] sm:$0xff]  ;;  %v240_v14 = vld [vmem:[%s219_s5 + $0x28] sm:$0xff]  ;;  %v241_v16 = vld [vmem:[%s219_s5 + $0x30] sm:$0xff] }
  0x1a   : > { %759 = vmatmul.mubr.msk.f32.vlgmr.msra.gmra.mrb[0].mxu0 %vm265_vm0, %v235_v13  ;;  %764 = vmatmul.mubr.msk.f32.vlgmr.msra.gmra.mrb[0].mxu1 %vm265_vm0, %v240_v14  ;;  %v236_v15 = vld [vmem:[%s219_s5 + $0x8] sm:$0xff]  ;;  %v237_v17 = vld [vmem:[%s219_s5 + $0x10] sm:$0xff]  ;;  %v242_v18 = vld [vmem:[%s219_s5 + $0x38] sm:$0xff] }
  0x1b   : > { %366 = vmatprep.mubr.f32.mxu0 %v1039_v7  ;;  %396 = vmatprep.mubr.f32.mxu1 %v1039_v7  ;;  %v238_v19 = vld [vmem:[%s219_s5 + $0x18] sm:$0xff]  ;;  %v243_v20 = vld [vmem:[%s219_s5 + $0x40] sm:$0xff]  ;;  %v244_v22 = vld [vmem:[%s219_s5 + $0x48] sm:$0xff] }
  0x1c   : > { %v239_v21 = vld [vmem:[%s219_s5 + $0x20] sm:$0xff] }
  0x1e   : > { %760 = vmatmul.mubr.msk.f32.gmra.mrb[2].mxu0 %vm265_vm0, %v236_v15  ;;  %765 = vmatmul.mubr.msk.f32.gmra.mrb[2].mxu1 %vm265_vm0, %v241_v16 }
  0x1f   : > { %372 = vmatprep.mubr.f32.mxu0 %v1039_v7  ;;  %402 = vmatprep.mubr.f32.mxu1 %v1039_v7 }
  0x22   : > { %761 = vmatmul.mubr.msk.f32.gmra.mrb[4].mxu0 %vm265_vm0, %v237_v17  ;;  %766 = vmatmul.mubr.msk.f32.gmra.mrb[4].mxu1 %vm265_vm0, %v242_v18 }
  0x23   : > { %378 = vmatprep.mubr.f32.mxu0 %v1039_v7  ;;  %408 = vmatprep.mubr.f32.mxu1 %v1039_v7 }
  0x26   : > { %762 = vmatmul.mubr.msk.f32.gmra.mrb[6].mxu0 %vm265_vm0, %v238_v19  ;;  %767 = vmatmul.mubr.msk.f32.gmra.mrb[6].mxu1 %vm265_vm0, %v243_v20 }
  0x27   : > { %384 = vmatprep.mubr.f32.mxu0 %v1039_v7  ;;  %414 = vmatprep.mubr.f32.mxu1 %v1039_v7 }
  0x2a   : > { %763 = vmatmul.mubr.msk.f32.gmra.mrb[8].mxu0 %vm265_vm0, %v239_v21  ;;  %768 = vmatmul.mubr.msk.f32.gmra.mrb[8].mxu1 %vm265_vm0, %v244_v22 }
  0xed   : > { %v362_v30 = vpop.f32.mrb[0].mxu0  ;;  %v392_v31 = vpop.f32.mrb[0].mxu1 }
  0xee   : > { %v363_v32 = vadd.f32 %v362_v30, %v258_v28  ;;  %v393_v33 = vadd.f32 %v392_v31, %v258_v28  ;;  %v364_v34 = vpop.f32.mrb[1].mxu0  ;;  %v394_v35 = vpop.f32.mrb[1].mxu1 }
  0xef   : > { %v365_v36 = vadd.f32 %v364_v34, %v262_v29  ;;  %v395_v37 = vadd.f32 %v394_v35, %v262_v29 }
  0xf0   : > { %421 = vst [vmem:[%s1164_s11] sm:$0xff] %v363_v32  ;;  %426 = vst [vmem:[%s1164_s11 + $0x28] sm:$0xff] %v393_v33 }
  0xf1   : > { %432 = vst.msk [vmem:[%s1168_s12] sm:$0xff] %vm431_vm1, %v365_v36  ;;  %437 = vst.msk [vmem:[%s1168_s12 + $0x28] sm:$0xff] %vm431_vm1, %v395_v37  ;;  %v368_v38 = vpop.f32.mrb[2].mxu0  ;;  %v398_v39 = vpop.f32.mrb[2].mxu1 }
  0xf2   : > { %v369_v40 = vadd.f32 %v368_v38, %v258_v28  ;;  %v399_v41 = vadd.f32 %v398_v39, %v258_v28  ;;  %v370_v42 = vpop.f32.mrb[3].mxu0  ;;  %v400_v43 = vpop.f32.mrb[3].mxu1 }
  0xf3   : > { %v371_v44 = vadd.f32 %v370_v42, %v262_v29  ;;  %v401_v45 = vadd.f32 %v400_v43, %v262_v29 }
  0xf4   : > { %422 = vst [vmem:[%s1164_s11 + $0x8] sm:$0xff] %v369_v40  ;;  %427 = vst [vmem:[%s1164_s11 + $0x30] sm:$0xff] %v399_v41 }
  0xf5   : > { %433 = vst.msk [vmem:[%s1168_s12 + $0x8] sm:$0xff] %vm431_vm1, %v371_v44  ;;  %438 = vst.msk [vmem:[%s1168_s12 + $0x30] sm:$0xff] %vm431_vm1, %v401_v45  ;;  %v374_v46 = vpop.f32.mrb[4].mxu0  ;;  %v404_v47 = vpop.f32.mrb[4].mxu1 }
  0xf6   : > { %v375_v48 = vadd.f32 %v374_v46, %v258_v28  ;;  %v405_v49 = vadd.f32 %v404_v47, %v258_v28  ;;  %v376_v50 = vpop.f32.mrb[5].mxu0  ;;  %v406_v51 = vpop.f32.mrb[5].mxu1 }
  0xf7   : > { %v377_v52 = vadd.f32 %v376_v50, %v262_v29  ;;  %v407_v53 = vadd.f32 %v406_v51, %v262_v29 }
  0xf8   : > { %423 = vst [vmem:[%s1164_s11 + $0x10] sm:$0xff] %v375_v48  ;;  %428 = vst [vmem:[%s1164_s11 + $0x38] sm:$0xff] %v405_v49 }
  0xf9   : > { %434 = vst.msk [vmem:[%s1168_s12 + $0x10] sm:$0xff] %vm431_vm1, %v377_v52  ;;  %439 = vst.msk [vmem:[%s1168_s12 + $0x38] sm:$0xff] %vm431_vm1, %v407_v53  ;;  %v380_v54 = vpop.f32.mrb[6].mxu0  ;;  %v410_v55 = vpop.f32.mrb[6].mxu1 }
  0xfa   : > { %v381_v56 = vadd.f32 %v380_v54, %v258_v28  ;;  %v411_v57 = vadd.f32 %v410_v55, %v258_v28  ;;  %v382_v58 = vpop.f32.mrb[7].mxu0  ;;  %v412_v59 = vpop.f32.mrb[7].mxu1 }
  0xfb   : > { %v383_v60 = vadd.f32 %v382_v58, %v262_v29  ;;  %v413_v61 = vadd.f32 %v412_v59, %v262_v29  ;;  %453 = sbr.rel (!%p1106_p5) target bundleno = 286 (0x11e), region = 36 }
  0xfc   : > { %424 = vst [vmem:[%s1164_s11 + $0x18] sm:$0xff] %v381_v56  ;;  %429 = vst [vmem:[%s1164_s11 + $0x40] sm:$0xff] %v411_v57 }
  0xfd   : > { %435 = vst.msk [vmem:[%s1168_s12 + $0x18] sm:$0xff] %vm431_vm1, %v383_v60  ;;  %440 = vst.msk [vmem:[%s1168_s12 + $0x40] sm:$0xff] %vm431_vm1, %v413_v61  ;;  %v386_v62 = vpop.f32.mrb[8].mxu0  ;;  %v416_v63 = vpop.f32.mrb[8].mxu1 }
  0xfe   : > { %v387_v0 = vadd.f32 %v386_v62, %v258_v28  ;;  %v417_v1 = vadd.f32 %v416_v63, %v258_v28  ;;  %v388_v2 = vpop.f32.mrb[9].mxu0  ;;  %v418_v3 = vpop.f32.mrb[9].mxu1 }
  0xff   : > { %v389_v4 = vadd.f32 %v388_v2, %v262_v29  ;;  %v419_v5 = vadd.f32 %v418_v3, %v262_v29 }
 0x100   : > { %425 = vst [vmem:[%s1164_s11 + $0x20] sm:$0xff] %v387_v0  ;;  %430 = vst [vmem:[%s1164_s11 + $0x48] sm:$0xff] %v417_v1 }
 0x101   : > { %436 = vst.msk [vmem:[%s1168_s12 + $0x20] sm:$0xff] %vm431_vm1, %v389_v4  ;;  %441 = vst.msk [vmem:[%s1168_s12 + $0x48] sm:$0xff] %vm431_vm1, %v419_v5 }
 0x102   : > { %s1325_s14 = smov (!%p456_p11, %s455_s14), 10 }
 0x103   : > { %s1205_s20 = sshll.u32 %s1325_s14, 7 }
 0x104   : > { %s460_s22 = ssub.s32 1280, %s1205_s20 }
 0x105   : > { %461 = vsyncadd %s1200_s13, %s460_s22  ;;  %p770_p12 = scmp.ne.s32.totalorder %s1205_s20, 0  ;;  %s786_s23 = smul.u32 1280, %s1089_s19 }
 0x106   : > { %s466_s27 = sshll.u32 %s1164_s11, 4  ;;  %s1040_s6 = smov [#allocation2]   ;;  %s1217_s27 = int_to_ptr.vmem [resolvable:$true] %s466_s27 }
 0x107   : > { %s1215_s30 = scalar_lea.hbm %s1313_s3, %s786_s23  ;;  %s911_s5 = scalar_lea.vmem %s1217_s27, %s1205_s20 }
 0x108   : > { %p912_p13 = scmp.ne.s32.totalorder %s1217_s27, %s911_s5  ;;  %s915_s8 = sshll.u32 %s1040_s6, 4  ;;  %s916_s8 = int_to_ptr.vmem [resolvable:$false] %s915_s8 }
 0x109   : > { %s917_s9 = scalar_lea.vmem %s916_s8, 2560  ;;  %p918_p2 = scmp.lt.s32.totalorder %s1217_s27, %s916_s8 }
 0x10a   : > { %p913_p0 = pnand %p912_p13, %p770_p12  ;;  %p919_p3 = scmp.lt.s32.totalorder %s917_s9, %s911_s5 }
 0x10c   : > { %p914_p1 = pneg %p913_p0  ;;  %p920_p4 = por %p919_p3, %p918_p2 }
 0x10e   : > { %p921_p7 = pnand %p920_p4, %p914_p1 }
 0x110   : > { %924 = shalt.err (!%p921_p7)
}
 0x111   : > { %s925_s10 = scalar_lea.hbm %s1215_s30, %s1205_s20  ;;  %s929_s22 = scalar_lea.hbm %s1313_s3, 4864 }
 0x112   : > { %p926_p8 = scmp.ne.s32.totalorder %s1215_s30, %s925_s10  ;;  %p930_p11 = scmp.lt.u32.totalorder %s1215_s30, %s1313_s3 }
 0x113   : > { %p931_p13 = scmp.lt.u32.totalorder %s929_s22, %s925_s10  ;;  %p933_p1 = scmp.lt.u32.totalorder %s925_s10, %s1215_s30 }
 0x114   : > { %p927_p9 = pnand %p926_p8, %p770_p12 }
 0x115   : > { %p932_p0 = por %p931_p13, %p930_p11 }
 0x116   : > { %p928_p10 = pneg %p927_p9 }
 0x117   : > { %p934_p2 = por %p933_p1, %p932_p0 }
 0x119   : > { %p935_p3 = pnand %p934_p2, %p928_p10 }
 0x11b   : > { %938 = shalt.err (!%p935_p3)
}
 0x11c   : > { %s1041_s29 = smov 128   ;;  %s1042_s5 = smov 8  }
 0x11d   : > { %472 = dma.vmem_to_hbm [thread:$0]  (%p770_p12), %s1217_s27, %s1205_s20, %s1215_s30, %s1200_s13, %s1041_s29, %s1041_s29, %s1042_s5  }
 0x11e PF: > { %475 = sbr.rel (!%p1106_p5) target bundleno = 354 (0x162), region = 40  ;;  %s477_s6 = ssub.s32 (%p1106_p5), 38, %s1126_s7 }
 0x11f   : > { %s787_s8 = smul.u32 (%p1106_p5), 80, %s1089_s19  ;;  %p478_p4 = scmp.lt.s32.totalorder (%p1106_p5), %s477_s6, 10 }
 0x121   : > { %s1251_s11 = scalar_lea.vmem (%p1106_p5), %s1314_s4, %s787_s8  }
 0x125   : > { %s1327_s6 = smov (!%p478_p4, %s477_s6), 10 }
 0x126   : > { %s774_s14 = sshll.u32 %s1327_s6, 7 }
 0x127   : > { %p777_p7 = scmp.eq.s32.totalorder %s774_s14, 0 }
 0x128   : > { %907 = sdivrem.u32 (!%p777_p7), %s1327_s6, 10 }
 0x129   : > { %486 = sbr.rel (%p777_p7) target bundleno = 354 (0x162), region = 44 }
 0x131   : > { %s1257_s25 = spop.drf %907 }
 0x132   : > { %p778_p5 = scmp.le.s32.totalorder %s1257_s25, 0 }
 0x133   : > { %s1317_s19 = smov (!%p778_p5), %s1251_s11  ;;  %s1318_s7 = smov (!%p778_p5), %s1168_s12 }
 0x134   : > { %701 = sbr.rel (%p778_p5) target bundleno = 325 (0x145), region = 133  ;;  %s1266_s13 = smov (!%p778_p5), 0  }
 0x135   : > { %s1268_s20 = smov (!%p778_p5), 0  }
 0x13b LB: >> { %v568_v6 = vld [vmem:[%s1013_s7] sm:$0xff]  ;;  %v570_v7 = vld [vmem:[%s1013_s7 + $0x8] sm:$0xff]  ;;  %v572_v8 = vld [vmem:[%s1013_s7 + $0x10] sm:$0xff]  ;;  %s588_s27 = sadd.s32 1, %s1017_s13  ;;  %s562_s20 = sadd.s32 1, %s1021_s20   ;;  %s1021_s20 = sphi %s1268_s20, %s562_s20   ;;  %s1017_s13 = sphi %s1266_s13, %s1319_s13   ;;  %s1013_s7 = sphi %s1318_s7, %s593_s7   ;;  %s1009_s19 = sphi %s1317_s19, %s594_s19  }
 0x13c   : >> { %569 = vst [vmem:[%s1009_s19] sm:$0xff] %v568_v6  ;;  %571 = vst [vmem:[%s1009_s19 + $0x8] sm:$0xff] %v570_v7  ;;  %v574_v9 = vld [vmem:[%s1013_s7 + $0x18] sm:$0xff]  ;;  %v576_v10 = vld [vmem:[%s1013_s7 + $0x20] sm:$0xff]  ;;  %p589_p12 = scmp.ge.s32.totalorder %s588_s27, %s1257_s25  ;;  %p561_p8 = scmp.ge.s32.totalorder %s562_s20, %s1257_s25 }
 0x13d   : >> { %573 = vst [vmem:[%s1009_s19 + $0x10] sm:$0xff] %v572_v8  ;;  %v578_v11 = vld [vmem:[%s1013_s7 + $0x28] sm:$0xff]  ;;  %575 = vst [vmem:[%s1009_s19 + $0x18] sm:$0xff] %v574_v9  ;;  %v580_v12 = vld [vmem:[%s1013_s7 + $0x30] sm:$0xff] }
 0x13e   : >> { %577 = vst [vmem:[%s1009_s19 + $0x20] sm:$0xff] %v576_v10  ;;  %579 = vst [vmem:[%s1009_s19 + $0x28] sm:$0xff] %v578_v11  ;;  %v582_v13 = vld [vmem:[%s1013_s7 + $0x38] sm:$0xff]  ;;  %v584_v14 = vld [vmem:[%s1013_s7 + $0x40] sm:$0xff]  ;;  %s1329_s27 = smov (%p589_p12, %s588_s27), 0  ;;  %564 = sbr.rel (!%p561_p8) target bundleno = 315 (0x13b), region = 139 }
 0x13f   : >> { %581 = vst [vmem:[%s1009_s19 + $0x30] sm:$0xff] %v580_v12  ;;  %583 = vst [vmem:[%s1009_s19 + $0x38] sm:$0xff] %v582_v13  ;;  %v586_v15 = vld [vmem:[%s1013_s7 + $0x48] sm:$0xff]  ;;  %s591_s30 = smul.u32 80, %s1329_s27  ;;  %s1319_s13 = smov %s1329_s27 }
 0x140   : >> { %585 = vst [vmem:[%s1009_s19 + $0x40] sm:$0xff] %v584_v14  ;;  %587 = vst [vmem:[%s1009_s19 + $0x48] sm:$0xff] %v586_v15 }
 0x141   : >> { %s593_s7 = scalar_lea.vmem %s1168_s12, %s591_s30 [#allocation4]   ;;  %s594_s19 = scalar_lea.vmem %s1251_s11, %s591_s30  }
 0x145 PF: > { %909 = sdivrem.u32 %s1327_s6, 10 }
 0x146   : > { %s779_s22 = smul.u32 80, %s1257_s25 }
 0x148   : > { %s599_s23 = scalar_lea.vmem %s1168_s12, %s779_s22 [#allocation4]   ;;  %s601_s28 = scalar_lea.vmem %s1251_s11, %s779_s22  }
 0x14e   : > { %s910_s29 = spop.drf %909 }
 0x14f   : > { %p781_p9 = scmp.le.s32.totalorder %s910_s29, 0 }
 0x150   : > { %s1023_s5 = smov (!%p781_p9), %s601_s28   ;;  %s1027_s8 = smov (!%p781_p9), %s599_s23  }
 0x151   : > { %715 = sbr.rel (%p781_p9) target bundleno = 354 (0x162), region = 144  ;;  %s1031_s9 = smov (!%p781_p9), 0  }
 0x152   : > { %s1035_s10 = smov (!%p781_p9), 0  }
 0x158 LB: >> { %v611_v16 = vld [vmem:[%s1029_s8] sm:$0xff]  ;;  %s613_s14 = sadd.s32 1, %s1033_s9  ;;  %s605_s10 = sadd.s32 1, %s1037_s10   ;;  %s1037_s10 = sphi %s1035_s10, %s605_s10   ;;  %s1033_s9 = sphi %s1031_s9, %s1032_s9   ;;  %s1029_s8 = sphi %s1027_s8, %s618_s8   ;;  %s1025_s5 = sphi %s1023_s5, %s619_s5  }
 0x159   : >> { %612 = vst [vmem:[%s1025_s5] sm:$0xff] %v611_v16  ;;  %p614_p10 = scmp.ge.s32.totalorder %s613_s14, %s910_s29  ;;  %p604_p11 = scmp.ge.s32.totalorder %s605_s10, %s910_s29 }
 0x15b   : >> { %s1331_s14 = smov (%p614_p10, %s613_s14), 0  ;;  %607 = sbr.rel (!%p604_p11) target bundleno = 344 (0x158), region = 150 }
 0x15c   : >> { %s782_s12 = sshll.u32 %s1331_s14, 3  ;;  %s1032_s9 = smov %s1331_s14  }
 0x15d   : >> { %s618_s8 = scalar_lea.vmem %s599_s23, %s782_s12 [#allocation4]   ;;  %s619_s5 = scalar_lea.vmem %s601_s28, %s782_s12  }
 0x162 PF: > { %p806_p13 = scmp.ge.s32.totalorder %s1005_s18, 2  ;;  %s631_s6 = sand.u32 1, %s993_s15  }
 0x163   : > { %s632_s11 = scalar_lea.sflag [#allocation3], %s631_s6 }
 0x164   : > { %p803_p0 = pnand %p806_p13, %p1110_p6 }
 0x166   : > { %988 = dma.done.wait (!%p803_p0), %s632_s11, 1280  }
 0x167   : > { %990 = vsyncadd (!%p803_p0), %s632_s11, 4294966016  ;;  %p15_p1 = scmp.ge.s32.totalorder %s1093_s21, 6   ;;  %s1320_s15 = smov %s997_s16 }
 0x168   : > { %s1321_s16 = smov %s1001_s17  ;;  %s1322_s17 = smov %s1104_s24 }
 0x169   : > { %s1323_s18 = smov %s1093_s21  ;;  %17 = sbr.rel (!%p15_p1) target bundleno = 3 (0x3), region = 161 }
 0x170   :  { %644 = vsyncpa [#allocation3], 1 }
 0x171   :  { %646 = vsyncpa [#allocation3 + $0x1], 1 }

</bundles_post_ra>
